<compile_context>
chip_gen: v7x
topology: tpu7x:2x2x1
jax: 0.10.0
libtpu: 0.0.40
codegen_flags: <defaults>
</compile_context>

<pallas_src>
import jax
import jax.numpy as jnp
import numpy as np
from jax.experimental import pallas as pl
from jax.experimental.pallas import tpu as pltpu

# --- graph / model dims (same tiny example graph as the PyTorch script) -------
EDGES = [(0, 1), (0, 2), (1, 2), (2, 3), (3, 4), (4, 5), (5, 0)]
NUM_NODES = max(max(u, v) for u, v in EDGES) + 1          # 6

IN_FEATS = 16
HIDDEN = 32
OUT_FEATS = 8

N_PAD = 8            # node rows per graph padded to one sublane tile
LANES = 128          # lane width of every MXU operand / the output tile

# --- weight-slab row offsets (all multiples of 8 -> tile-aligned slices) -------
R_W1S = 0                         # [16 rows]  W1_self   zero-padded to 128 lanes
R_W1N = R_W1S + IN_FEATS          # [16 rows]  W1_neigh  zero-padded to 128 lanes
R_W2S = R_W1N + IN_FEATS          # [128 rows] W2_self   zero-padded rows & lanes
R_W2N = R_W2S + LANES             # [128 rows] W2_neigh  zero-padded rows & lanes
R_B1 = R_W2N + LANES              # [8 rows]   b1 replicated across rows
R_B2 = R_B1 + N_PAD               # [8 rows]   b2 replicated across rows
W_ROWS = R_B2 + N_PAD             # 304 rows  (~152 KiB, resident in VMEM)


# --- Pallas kernel: whole GraphSAGE forward for one block of graphs -----------
def graphsage_kernel(x_ref, adj_ref, w_ref, out_ref):
    g = x_ref.shape[0]                                     # graphs in this block

    x = x_ref[...].reshape(g * N_PAD, IN_FEATS)            # [g*8, 16]
    adj = adj_ref[...]                                     # [g, 8, 8]
    w1s = w_ref[R_W1S:R_W1S + IN_FEATS, :]                 # [16, 128]
    w1n = w_ref[R_W1N:R_W1N + IN_FEATS, :]                 # [16, 128]
    w2s = w_ref[R_W2S:R_W2S + LANES, :]                    # [128, 128]
    w2n = w_ref[R_W2N:R_W2N + LANES, :]                    # [128, 128]
    b1 = w_ref[R_B1:R_B1 + N_PAD, :]                       # [8, 128] row-replicated
    b2 = w_ref[R_B2:R_B2 + N_PAD, :]                       # [8, 128] row-replicated

    # ---- SAGEConv layer 1 ('mean'): h1 = relu(x@W1s + (adj@x)@W1n + b1) ----
    self1 = jnp.dot(x, w1s, preferred_element_type=jnp.float32)        # [g*8, 128]
    xn1 = jnp.dot(x, w1n, preferred_element_type=jnp.float32)          # [g*8, 128]
    neigh1 = jnp.einsum('gij,gjh->gih', adj, xn1.reshape(g, N_PAD, LANES),
                        preferred_element_type=jnp.float32)            # [g, 8, 128]
    h1 = jnp.maximum(self1.reshape(g, N_PAD, LANES) + neigh1 + b1[None], 0.0)
    # Lanes HIDDEN..127 of h1 are exactly zero (zero-padded W1 columns and b1
    # lanes), so feeding the full 128-lane h1 into the 128-row zero-padded W2
    # blocks below is mathematically exact and keeps everything lane-dense.
    h1_2d = h1.reshape(g * N_PAD, LANES)                               # [g*8, 128]

    # ---- SAGEConv layer 2 ('mean'): out = h1@W2s + (adj@h1)@W2n + b2 ----
    self2 = jnp.dot(h1_2d, w2s, preferred_element_type=jnp.float32)    # [g*8, 128]
    hn2 = jnp.dot(h1_2d, w2n, preferred_element_type=jnp.float32)      # [g*8, 128]
    neigh2 = jnp.einsum('gij,gjh->gih', adj, hn2.reshape(g, N_PAD, LANES),
                        preferred_element_type=jnp.float32)            # [g, 8, 128]
    # Padded node rows 6..7 hold garbage but never leak (zero adjacency cols);
    # wrapper slices them away.  Full-width unmasked store.
    out_ref[...] = self2.reshape(g, N_PAD, LANES) + neigh2 + b2[None]


# --- wrapper -------------------------------------------------------------------
def graphsage_forward(x_slab, adj_slab, w_slab, *, graphs_per_block=4):
    """x_slab: [B, 8, IN_FEATS], adj_slab: [B, 8, 8], w_slab: [W_ROWS, 128].

    Returns node embeddings of shape [B, NUM_NODES, OUT_FEATS].
    """
    b = x_slab.shape[0]
    assert b % graphs_per_block == 0, "batch must be a multiple of graphs_per_block"
    gpb = graphs_per_block
    grid = (b // gpb,)

    flops_per_graph = 2 * (2 * N_PAD * IN_FEATS * LANES        # x @ W1s, x @ W1n
                           + 2 * N_PAD * N_PAD * LANES         # both adj aggregations
                           + 2 * N_PAD * LANES * LANES)        # h1 @ W2s, h1 @ W2n
    bytes_accessed = (b * (N_PAD * IN_FEATS + N_PAD * N_PAD + N_PAD * LANES)
                      + W_ROWS * LANES) * 4

    out = pl.pallas_call(
        graphsage_kernel,
        out_shape=jax.ShapeDtypeStruct((b, N_PAD, LANES), jnp.float32),
        grid=grid,
        in_specs=[
            pl.BlockSpec((gpb, N_PAD, IN_FEATS), lambda i: (i, 0, 0)),   # per-graph x
            pl.BlockSpec((gpb, N_PAD, N_PAD), lambda i: (i, 0, 0)),      # per-graph adj
            pl.BlockSpec((W_ROWS, LANES), lambda i: (0, 0)),             # resident weights
        ],
        out_specs=pl.BlockSpec((gpb, N_PAD, LANES), lambda i: (i, 0, 0)),
        compiler_params=pltpu.CompilerParams(
            dimension_semantics=("parallel",)),
        cost_estimate=pl.CostEstimate(flops=b * flops_per_graph,
                                      transcendentals=0,
                                      bytes_accessed=bytes_accessed),
    )(x_slab, adj_slab, w_slab)
    return out[:, :NUM_NODES, :OUT_FEATS]


# --- host-side packing -----------------------------------------------------------
def build_weight_slab(p):
    w = np.zeros((W_ROWS, LANES), np.float32)
    w[R_W1S:R_W1S + IN_FEATS, :HIDDEN] = np.asarray(p["w1s"])
    w[R_W1N:R_W1N + IN_FEATS, :HIDDEN] = np.asarray(p["w1n"])
    w[R_W2S:R_W2S + HIDDEN, :OUT_FEATS] = np.asarray(p["w2s"])
    w[R_W2N:R_W2N + HIDDEN, :OUT_FEATS] = np.asarray(p["w2n"])
    w[R_B1:R_B1 + N_PAD, :HIDDEN] = np.asarray(p["b1"])[None, :]       # replicate rows
    w[R_B2:R_B2 + N_PAD, :OUT_FEATS] = np.asarray(p["b2"])[None, :]    # replicate rows
    return jnp.asarray(w)


def build_graph_slabs(features, adj):
    """features: [B, NUM_NODES, IN_FEATS]; adj: [NUM_NODES, NUM_NODES] (shared)."""
    b = features.shape[0]
    x = np.zeros((b, N_PAD, IN_FEATS), np.float32)
    x[:, :NUM_NODES, :] = np.asarray(features)
    a = np.zeros((b, N_PAD, N_PAD), np.float32)
    a[:, :NUM_NODES, :NUM_NODES] = np.asarray(adj)[None]
    return jnp.asarray(x), jnp.asarray(a)


# --- pure-JAX reference for the correctness check -------------------------------
def reference_forward(x, adj, p):
    h1 = jnp.maximum(x @ p["w1s"] + (adj @ x) @ p["w1n"] + p["b1"], 0.0)
    h2 = h1 @ p["w2s"] + (adj @ h1) @ p["w2n"] + p["b2"]
    return h2


if __name__ == "__main__":
    key = jax.random.PRNGKey(0)
    k_feat, k1, k2, k3, k4, k5, k6 = jax.random.split(key, 7)

    B = 8  # small demo batch of graphs (same topology, different features)
    features = jax.random.normal(k_feat, (B, NUM_NODES, IN_FEATS), jnp.float32)

    # SAGEConv(in, out, 'mean'): W_self [in,out], W_neigh [in,out], bias [out]
    scale = 0.1
    params = {
        "w1s": scale * jax.random.normal(k1, (IN_FEATS, HIDDEN), jnp.float32),
        "w1n": scale * jax.random.normal(k2, (IN_FEATS, HIDDEN), jnp.float32),
        "b1": scale * jax.random.normal(k3, (HIDDEN,), jnp.float32),
        "w2s": scale * jax.random.normal(k4, (HIDDEN, OUT_FEATS), jnp.float32),
        "w2n": scale * jax.random.normal(k5, (HIDDEN, OUT_FEATS), jnp.float32),
        "b2": scale * jax.random.normal(k6, (OUT_FEATS,), jnp.float32),
    }

    # row-normalized in-adjacency: A[v, u] = 1/in_deg(v) for edge u -> v
    # (mean-neighbor aggregation == A @ H; zero-in-degree rows stay zero)
    adj_np = np.zeros((NUM_NODES, NUM_NODES), np.float32)
    for u, v in EDGES:
        adj_np[v, u] = 1.0
    deg = adj_np.sum(axis=1, keepdims=True)
    adj_np = adj_np / np.maximum(deg, 1.0)
    adj = jnp.asarray(adj_np)

    x_slab, adj_slab = build_graph_slabs(features, adj)
    w_slab = build_weight_slab(params)

    emb = graphsage_forward(x_slab, adj_slab, w_slab, graphs_per_block=4)
    emb = jax.block_until_ready(emb)

    ref = jax.vmap(lambda f: reference_forward(f, adj, params))(features)
    np.testing.assert_allclose(np.asarray(emb), np.asarray(ref),
                               rtol=1e-5, atol=1e-5)
    assert emb.shape == (B, NUM_NODES, OUT_FEATS)

    print("KERNEL_OK")
</pallas_src>

<mosaic_0001>
module attributes {stable_mosaic.version = 11 : i64} {
  func.func @graphsage_kernel(%arg0: i32, %arg1: memref<4x8x16xf32, #tpu.memory_space<vmem>>, %arg2: memref<4x8x8xf32, #tpu.memory_space<vmem>>, %arg3: memref<304x128xf32, #tpu.memory_space<vmem>>, %arg4: memref<4x8x128xf32, #tpu.memory_space<vmem>>) attributes {dimension_semantics = [#tpu.dimension_semantics<parallel>], iteration_bounds = array<i64: 2>, scalar_prefetch = 0 : i64, scratch_operands = 0 : i64, tpu.core_type = #tpu.core_type<tc>, window_params = [{transform_indices = @transform_0, window_bounds = array<i64: 4, 8, 16>}, {transform_indices = @transform_1, window_bounds = array<i64: 4, 8, 8>}, {pipeline_mode = #tpu.pipeline_mode<synchronous>, transform_indices = @transform_2, window_bounds = array<i64: 304, 128>}, {transform_indices = @transform_3, window_bounds = array<i64: 4, 8, 128>}]} {
    %c0 = arith.constant 0 : index
    %c0_0 = arith.constant 0 : index
    %c0_1 = arith.constant 0 : index
    %0 = vector.load %arg1[%c0, %c0_0, %c0_1] : memref<4x8x16xf32, #tpu.memory_space<vmem>>, vector<4x8x16xf32>
    %1 = vector.shape_cast %0 : vector<4x8x16xf32> to vector<32x16xf32>
    %c0_2 = arith.constant 0 : index
    %c0_3 = arith.constant 0 : index
    %c0_4 = arith.constant 0 : index
    %2 = vector.load %arg2[%c0_2, %c0_3, %c0_4] : memref<4x8x8xf32, #tpu.memory_space<vmem>>, vector<4x8x8xf32>
    %c0_5 = arith.constant 0 : index
    %c0_6 = arith.constant 0 : index
    %3 = vector.load %arg3[%c0_5, %c0_6] : memref<304x128xf32, #tpu.memory_space<vmem>>, vector<16x128xf32>
    %c16 = arith.constant 16 : index
    %c0_7 = arith.constant 0 : index
    %4 = vector.load %arg3[%c16, %c0_7] : memref<304x128xf32, #tpu.memory_space<vmem>>, vector<16x128xf32>
    %c32 = arith.constant 32 : index
    %c0_8 = arith.constant 0 : index
    %5 = vector.load %arg3[%c32, %c0_8] : memref<304x128xf32, #tpu.memory_space<vmem>>, vector<128x128xf32>
    %c160 = arith.constant 160 : index
    %c0_9 = arith.constant 0 : index
    %6 = vector.load %arg3[%c160, %c0_9] : memref<304x128xf32, #tpu.memory_space<vmem>>, vector<128x128xf32>
    %c288 = arith.constant 288 : index
    %c0_10 = arith.constant 0 : index
    %7 = vector.load %arg3[%c288, %c0_10] : memref<304x128xf32, #tpu.memory_space<vmem>>, vector<8x128xf32>
    %c296 = arith.constant 296 : index
    %c0_11 = arith.constant 0 : index
    %8 = vector.load %arg3[%c296, %c0_11] : memref<304x128xf32, #tpu.memory_space<vmem>>, vector<8x128xf32>
    %cst = arith.constant dense<0.000000e+00> : vector<32x128xf32>
    %9 = tpu.matmul %1, %3, %cst {dimension_numbers = #tpu.dot_dimension_numbers<[1], [0], [0], [1], [0, 0, 1, 1], [], []>} : vector<32x16xf32>, vector<16x128xf32>, vector<32x128xf32> -> vector<32x128xf32>
    %cst_12 = arith.constant dense<0.000000e+00> : vector<32x128xf32>
    %10 = tpu.matmul %1, %4, %cst_12 {dimension_numbers = #tpu.dot_dimension_numbers<[1], [0], [0], [1], [0, 0, 1, 1], [], []>} : vector<32x16xf32>, vector<16x128xf32>, vector<32x128xf32> -> vector<32x128xf32>
    %11 = vector.shape_cast %10 : vector<32x128xf32> to vector<4x8x128xf32>
    "tpu.trace_start"() <{level = 10 : i32, message = "gij,gjh->gih"}> : () -> ()
    %cst_13 = arith.constant dense<0.000000e+00> : vector<4x8x128xf32>
    %12 = tpu.matmul %2, %11, %cst_13 {dimension_numbers = #tpu.dot_dimension_numbers<[2], [1], [1], [2], [0, 0, 0, 1, 1, 2], [0], [0]>} : vector<4x8x8xf32>, vector<4x8x128xf32>, vector<4x8x128xf32> -> vector<4x8x128xf32>
    "tpu.trace_stop"() : () -> ()
    %13 = vector.shape_cast %9 : vector<32x128xf32> to vector<4x8x128xf32>
    %14 = arith.addf %13, %12 : vector<4x8x128xf32>
    %15 = vector.shape_cast %7 : vector<8x128xf32> to vector<1x8x128xf32>
    %16 = vector.broadcast %15 : vector<1x8x128xf32> to vector<4x8x128xf32>
    %17 = arith.addf %14, %16 : vector<4x8x128xf32>
    %cst_14 = arith.constant 0.000000e+00 : f32
    %18 = vector.broadcast %cst_14 : f32 to vector<4x8x128xf32>
    %19 = arith.maximumf %17, %18 : vector<4x8x128xf32>
    %20 = vector.shape_cast %19 : vector<4x8x128xf32> to vector<32x128xf32>
    %cst_15 = arith.constant dense<0.000000e+00> : vector<32x128xf32>
    %21 = tpu.matmul %20, %5, %cst_15 {dimension_numbers = #tpu.dot_dimension_numbers<[1], [0], [0], [1], [0, 0, 1, 1], [], []>} : vector<32x128xf32>, vector<128x128xf32>, vector<32x128xf32> -> vector<32x128xf32>
    %cst_16 = arith.constant dense<0.000000e+00> : vector<32x128xf32>
    %22 = tpu.matmul %20, %6, %cst_16 {dimension_numbers = #tpu.dot_dimension_numbers<[1], [0], [0], [1], [0, 0, 1, 1], [], []>} : vector<32x128xf32>, vector<128x128xf32>, vector<32x128xf32> -> vector<32x128xf32>
    %23 = vector.shape_cast %22 : vector<32x128xf32> to vector<4x8x128xf32>
    "tpu.trace_start"() <{level = 10 : i32, message = "gij,gjh->gih"}> : () -> ()
    %cst_17 = arith.constant dense<0.000000e+00> : vector<4x8x128xf32>
    %24 = tpu.matmul %2, %23, %cst_17 {dimension_numbers = #tpu.dot_dimension_numbers<[2], [1], [1], [2], [0, 0, 0, 1, 1, 2], [0], [0]>} : vector<4x8x8xf32>, vector<4x8x128xf32>, vector<4x8x128xf32> -> vector<4x8x128xf32>
    "tpu.trace_stop"() : () -> ()
    %25 = vector.shape_cast %21 : vector<32x128xf32> to vector<4x8x128xf32>
    %26 = arith.addf %25, %24 : vector<4x8x128xf32>
    %27 = vector.shape_cast %8 : vector<8x128xf32> to vector<1x8x128xf32>
    %28 = vector.broadcast %27 : vector<1x8x128xf32> to vector<4x8x128xf32>
    %29 = arith.addf %26, %28 : vector<4x8x128xf32>
    %c0_18 = arith.constant 0 : index
    %c0_19 = arith.constant 0 : index
    %c0_20 = arith.constant 0 : index
    %30 = vector.load %arg4[%c0_18, %c0_19, %c0_20] : memref<4x8x128xf32, #tpu.memory_space<vmem>>, vector<4x8x128xf32>
    tpu.vector_store %arg4[%c0_18, %c0_19, %c0_20], %29 {strides = array<i32>} : memref<4x8x128xf32, #tpu.memory_space<vmem>>, vector<4x8x128xf32>,
    return
  }
  func.func @transform_0(%arg0: i32) -> (i32, i32, i32) {
    %c0_i32 = arith.constant 0 : i32
    %c0_i32_0 = arith.constant 0 : i32
    %c0_i32_1 = arith.constant 0 : i32
    return %arg0, %c0_i32, %c0_i32_0 : i32, i32, i32
  }
  func.func @transform_1(%arg0: i32) -> (i32, i32, i32) {
    %c0_i32 = arith.constant 0 : i32
    %c0_i32_0 = arith.constant 0 : i32
    %c0_i32_1 = arith.constant 0 : i32
    return %arg0, %c0_i32, %c0_i32_0 : i32, i32, i32
  }
  func.func @transform_2(%arg0: i32) -> (i32, i32) {
    %c0_i32 = arith.constant 0 : i32
    %c0_i32_0 = arith.constant 0 : i32
    %c0_i32_1 = arith.constant 0 : i32
    return %c0_i32, %c0_i32_0 : i32, i32
  }
  func.func @transform_3(%arg0: i32) -> (i32, i32, i32) {
    %c0_i32 = arith.constant 0 : i32
    %c0_i32_0 = arith.constant 0 : i32
    %c0_i32_1 = arith.constant 0 : i32
    return %arg0, %c0_i32, %c0_i32_0 : i32, i32, i32
  }
}

</mosaic_0001>

<bundles_post_ra>
// kernel: tpu_custom_call.1
= control target key start
LH: loop header
LB: loop body
LE: loop exit
PB: predicated region body
PF: predicated region fallthrough
CT: control target
= control target key end

     0   :  { %s2270_s0 = inlined_call_operand.hbm [shape: f32[8,8,16], index: 0, kind: input, shape index: {}]   ;;  %s2271_s1 = inlined_call_operand.hbm [shape: f32[8,8,8], index: 1, kind: input, shape index: {}]   ;;  %s2272_s2 = inlined_call_operand.hbm [shape: f32[304,128], index: 2, kind: input, shape index: {}]   ;;  %s2273_s3 = inlined_call_operand.hbm [shape: f32[8,8,128], index: 3, kind: output, shape index: {}]  }
   0x1   :  { %2281 = sst [smem:[#allocation13_spill]] %s2270_s0 }
   0x2   :  { %2282 = sst [smem:[#allocation14_spill]] %s2272_s2 }
   0x3   :  { %8 = vsyncpa [#allocation3], 0 }
   0x4   :  { %10 = vsyncpa [#allocation3 + $0x1], 0 }
   0x5   :  { %11 = vsyncpa [#allocation6], 0 }
   0x6   :  { %13 = vsyncpa [#allocation6 + $0x1], 0 }
   0x7   :  { %14 = vsyncpa [#allocation4], 0 }
   0x8   :  { %16 = vsyncpa [#allocation4 + $0x1], 0  ;;  %s1938_s12 = smov 0   ;;  %s1940_s13 = smov 0  }
   0x9   :  { %s1942_s14 = smov 0   ;;  %s1944_s15 = smov 0  }
   0xa LB: > { %s1959_s16 = sadd.s32 4294967295, %s1906_s15   ;;  %s1361_s17 = sadd.s32 4294967294, %s1906_s15   ;;  %s1906_s15 = sphi %s1944_s15, %s2303_s15   ;;  %s1902_s14 = sphi %s1942_s14, %s2302_s14   ;;  %s1898_s13 = sphi %s1940_s13, %s2301_s13   ;;  %s1894_s12 = sphi %s1938_s12, %s2300_s12  }
   0xb   : > { %p42_p0 = scmp.ne.s32.totalorder %s1898_s13, %s1894_s12  ;;  %p2274_p1 = scmp.eq.s32.totalorder %s1959_s16, 0 }
   0xc   : > { %p119_p3 = scmp.eq.s32.totalorder %s1361_s17, 1  ;;  %p1362_p5 = scmp.ge.s32.totalorder %s1906_s15, 1 }
   0xd   : > { %p1968_p4 = por %p2274_p1, %p42_p0  ;;  %p126_p7 = scmp.lt.s32.totalorder %s1906_s15, 3 }
   0xe   : > { %p1973_p6 = por %p119_p3, %p42_p0  ;;  %s1908_s21 = smov [#allocation7]  }
   0xf   : > { %s2283_s18 = scalar_select %p1968_p4, 1, 0 }
  0x10   : > { %s2284_s19 = scalar_select %p1973_p6, 1, 0 }
  0x11   : > { %p1978_p8 = pnand %p1362_p5, %p126_p7  ;;  %s138_s22 = sshll.u32 %s1908_s21, 4  ;;  %s1982_s22 = int_to_ptr.vmem [resolvable:$true] %s138_s22 }
  0x12   : > { %s1994_s24 = sadd.s32 1, %s1906_s15   ;;  %s29_s25 = sadd.s32 1, %s1902_s14 }
  0x13   : > { %s2285_s20 = scalar_select %p1978_p8, 1, 0 }
  0x14   : > { %p1686_p9 = pneg %p1978_p8  ;;  %s26_s26 = ssub.s32 %s1906_s15, %s1994_s24 }
  0x15   : > { %s2287_s2 = sld [smem:[#allocation14_spill]] }
  0x16   : > { %p1989_p11 = pnand %p1686_p9, %p2274_p1 }
  0x18   : > { %p1746_p13 = pneg %p1989_p11 }
  0x1b   : > { %s1744_s29 = scalar_lea.hbm %s2287_s2, 4864 }
  0x1c   : > { %p1745_p12 = scmp.ne.s32.totalorder %s2287_s2, %s1744_s29  ;;  %p1751_p5 = scmp.lt.u32.totalorder %s1744_s29, %s2287_s2 }
  0x1e   : > { %p1747_p0 = pnand %p1746_p13, %p1745_p12 }
  0x20   : > { %p1748_p3 = pneg %p1747_p0 }
  0x22   : > { %p1753_p7 = pnand %p1751_p5, %p1748_p3 }
  0x24   : > { %1756 = shalt.err (!%p1753_p7)
}
  0x25   : > { %s1757_s7 = scalar_lea.vmem %s1982_s22, 4864  ;;  %p1765_p2 = scmp.lt.s32.totalorder %s1982_s22, %s1982_s22 }
  0x26   : > { %p1758_p9 = scmp.ne.s32.totalorder %s1982_s22, %s1757_s7  ;;  %p1766_p6 = scmp.lt.s32.totalorder %s1757_s7, %s1757_s7 }
  0x28   : > { %p1760_p10 = pnand %p1758_p9, %p1746_p13  ;;  %p1767_p4 = por %p1766_p6, %p1765_p2 }
  0x2a   : > { %p1761_p1 = pneg %p1760_p10 }
  0x2c   : > { %p1768_p8 = pnand %p1767_p4, %p1761_p1 }
  0x2e   : > { %1771 = shalt.err (!%p1768_p8)
}
  0x2f   : > { %s2277_s8 = smov 128   ;;  %s2279_s9 = smov 8  }
  0x30   : > { %1689 = dma.hbm_to_vmem [thread:$0]  (!%p1989_p11), %s2287_s2, 4864, %s1982_s22, [#allocation6], %s2277_s8, %s2277_s8, %s2279_s9  }
  0x31   : > { %p27_p1 = scmp.eq.s32.totalorder %s26_s26, 0  ;;  %p36_p2 = scmp.ne.s32.totalorder %s1902_s14, %s1898_s13 }
  0x32   : > { %p37_p4 = scmp.eq.s32.totalorder %s1906_s15, 0  ;;  %p1702_p6 = scmp.lt.s32.totalorder %s1906_s15, 2 }
  0x33   : > { %s2028_s17 = scalar_select %p27_p1, %s1902_s14, %s29_s25  }
  0x34   : > { %p38_p8 = por %p37_p4, %p36_p2  ;;  %p2288_p10 = scmp.eq.s32.totalorder %s1959_s16, 1 }
  0x35   : > { %s152_s23 = sand.u32 1, %s1902_s14   ;;  %s1397_s27 = sshll.u32 %s1906_s15, 9 }
  0x36   : > { %p2032_p12 = por %p2288_p10, %p36_p2  ;;  %s2038_s28 = sshll.u32 %s152_s23, 5 }
  0x37   : > { %s2290_s0 = sld [smem:[#allocation13_spill]]  ;;  %s156_s25 = scalar_lea.vmem [#allocation2], %s2038_s28 }
  0x38   : > { %s163_s26 = sshll.u32 %s156_s25, 4  ;;  %p2046_p11 = pnand %p1702_p6, %p38_p8  ;;  %s2050_s26 = int_to_ptr.vmem [resolvable:$true] %s163_s26 }
  0x39   : > { %s2055_s7 = scalar_lea.hbm %s2271_s1, %s1397_s27  ;;  %s2057_s10 = scalar_lea.sflag [#allocation3], %s152_s23 }
  0x3a   : > { %p1774_p0 = pneg %p2046_p11 }
  0x3d   : > { %s2043_s22 = scalar_lea.hbm %s2290_s0, %s1397_s27  ;;  %s1777_s25 = scalar_lea.hbm %s2290_s0, 1024 }
  0x3e   : > { %s1772_s11 = scalar_lea.hbm %s2043_s22, 512  ;;  %p1778_p7 = scmp.lt.u32.totalorder %s2043_s22, %s2290_s0 }
  0x3f   : > { %p1773_p13 = scmp.ne.s32.totalorder %s2043_s22, %s1772_s11  ;;  %p1779_p9 = scmp.lt.u32.totalorder %s1777_s25, %s1772_s11 }
  0x40   : > { %p1781_p2 = scmp.lt.u32.totalorder %s1772_s11, %s2043_s22 }
  0x41   : > { %p1775_p3 = pnand %p1774_p0, %p1773_p13  ;;  %p1780_p1 = por %p1779_p9, %p1778_p7 }
  0x43   : > { %p1776_p5 = pneg %p1775_p3  ;;  %p1782_p4 = por %p1781_p2, %p1780_p1 }
  0x45   : > { %p1783_p6 = pnand %p1782_p4, %p1776_p5 }
  0x47   : > { %1786 = shalt.err (!%p1783_p6)
}
  0x48   : > { %s1787_s23 = scalar_lea.vmem %s2050_s26, 512  ;;  %s1911_s27 = smov [#allocation2]  }
  0x49   : > { %p1788_p8 = scmp.ne.s32.totalorder %s2050_s26, %s1787_s23  ;;  %s1792_s5 = sshll.u32 %s1911_s27, 4  ;;  %s1793_s5 = int_to_ptr.vmem [resolvable:$false] %s1792_s5 }
  0x4a   : > { %s1794_s8 = scalar_lea.vmem %s1793_s5, 1024  ;;  %p1795_p3 = scmp.lt.s32.totalorder %s2050_s26, %s1793_s5 }
  0x4b   : > { %p1790_p10 = pnand %p1788_p8, %p1774_p0  ;;  %p1796_p7 = scmp.lt.s32.totalorder %s1794_s8, %s1787_s23 }
  0x4d   : > { %p1791_p13 = pneg %p1790_p10  ;;  %p1797_p9 = por %p1796_p7, %p1795_p3 }
  0x4f   : > { %p1798_p1 = pnand %p1797_p9, %p1791_p13 }
  0x51   : > { %1801 = shalt.err (!%p1798_p1)
}
  0x52   : > { %s2292_s9 = smov 8   ;;  %s2293_s6 = smov 128  }
  0x53   : > { %1693 = dma.hbm_to_vmem [thread:$0]  (!%p2046_p11), %s2043_s22, 512, %s2050_s26, %s2057_s10, %s2293_s6, %s2293_s6, %s2292_s9  }
  0x54   : > { %s177_s11 = scalar_lea.vmem [#allocation5], %s2038_s28  ;;  %s173_s30 = sand.u32 1, %s1906_s15  }
  0x55   : > { %s184_s29 = sshll.u32 %s177_s11, 4  ;;  %s2092_s25 = scalar_lea.sflag [#allocation6], %s173_s30  ;;  %s2090_s29 = int_to_ptr.vmem [resolvable:$true] %s184_s29 }
  0x56   : > { %s1802_s23 = scalar_lea.hbm %s2055_s7, 512  ;;  %s1807_s8 = scalar_lea.hbm %s2271_s1, 1024 }
  0x57   : > { %p1803_p5 = scmp.ne.s32.totalorder %s2055_s7, %s1802_s23  ;;  %p1808_p6 = scmp.lt.u32.totalorder %s2055_s7, %s2271_s1 }
  0x58   : > { %p1809_p8 = scmp.lt.u32.totalorder %s1807_s8, %s1802_s23  ;;  %p1811_p13 = scmp.lt.u32.totalorder %s1802_s23, %s2055_s7 }
  0x59   : > { %p1805_p2 = pnand %p1803_p5, %p1774_p0 }
  0x5a   : > { %p1810_p10 = por %p1809_p8, %p1808_p6 }
  0x5b   : > { %p1806_p4 = pneg %p1805_p2 }
  0x5c   : > { %p1812_p3 = por %p1811_p13, %p1810_p10 }
  0x5e   : > { %p1813_p7 = pnand %p1812_p3, %p1806_p4 }
  0x60   : > { %1816 = shalt.err (!%p1813_p7)
}
  0x61   : > { %s1817_s28 = scalar_lea.vmem %s2090_s29, 512  ;;  %s1912_s22 = smov [#allocation5]  }
  0x62   : > { %p1818_p9 = scmp.ne.s32.totalorder %s2090_s29, %s1817_s28  ;;  %s1822_s26 = sshll.u32 %s1912_s22, 4  ;;  %s1823_s26 = int_to_ptr.vmem [resolvable:$false] %s1822_s26 }
  0x63   : > { %s1824_s0 = scalar_lea.vmem %s1823_s26, 1024  ;;  %p1825_p2 = scmp.lt.s32.totalorder %s2090_s29, %s1823_s26 }
  0x64   : > { %p1820_p1 = pnand %p1818_p9, %p1774_p0  ;;  %p1826_p6 = scmp.lt.s32.totalorder %s1824_s0, %s1817_s28 }
  0x66   : > { %p1821_p5 = pneg %p1820_p1  ;;  %p1827_p8 = por %p1826_p6, %p1825_p2 }
  0x68   : > { %p1828_p10 = pnand %p1827_p8, %p1821_p5 }
  0x6a   : > { %1831 = shalt.err (!%p1828_p10)
}
  0x6b   : > { %1696 = dma.hbm_to_vmem [thread:$0]  (!%p2046_p11), %s2055_s7, 512, %s2090_s29, %s2092_s25, %s2293_s6, %s2293_s6, %s2292_s9  }
  0x6c   : > { %p2294_p0 = scmp.ne.s32.totalorder %s2285_s20, 0 }
  0x6d   : > { %s2124_s2 = sand.u32 (!%p2294_p0), 1, %s1898_s13   ;;  %p2295_p4 = scmp.ne.s32.totalorder (!%p2294_p0), %s2283_s18, 0 }
  0x6e   : > { %196 = sbr.rel (%p2294_p0) target bundleno = 1013 (0x3f5), region = 32  ;;  %s2127_s10 = sshll.u32 (!%p2294_p0), %s2124_s2, 5 }
  0x6f   : > { %s199_s4 = scalar_lea.sflag (!%p2294_p0), [#allocation3], %s2124_s2  ;;  %s202_s11 = scalar_lea.vmem (!%p2294_p0), [#allocation2], %s2127_s10 }
  0x75   : > { %1877 = dma.done.wait (%p2295_p4), %s199_s4, 512  }
  0x76   : > { %1879 = vsyncadd (%p2295_p4), %s199_s4, 4294966784  ;;  %s207_s20 = sand.u32 1, %s1959_s16   ;;  %s2137_s9 = scalar_lea.vmem [#allocation5], %s2127_s10 }
  0x77   : > { %s208_s7 = scalar_lea.sflag [#allocation6], %s207_s20 }
  0x78   : > { %1881 = dma.done.wait (%p2295_p4), %s208_s7, 512  }
  0x79   : > { %1883 = vsyncadd (%p2295_p4), %s208_s7, 4294966784  ;;  %p2296_p11 = scmp.eq.s32.totalorder %s1959_s16, 0 }
  0x7b   : > { %1885 = dma.done.wait (%p2296_p11), [#allocation6], 4864   ;;  %p2297_p13 = pmov %p2296_p11 }
  0x7c   : > { %vm292_vm0 = vcmask 130048   ;;  %v256_v0 = vld [vmem:[#allocation7 + $0x10] sm:$0xff]  ;;  %v257_v1 = vld [vmem:[#allocation7 + $0x18] sm:$0xff]  ;;  %v246_v2 = vld [vmem:[%s202_s11] sm:$0xff]  ;;  %v1913_v10 = vmov 0.0   ;;  %vm1914_vm1 = vmmov 0  }
  0x7d   : > { %1887 = vsyncadd (%p2297_p13), [#allocation6], 4294962432  ;;  %v1608_v3 = vpack.c.bf16 %v257_v1, %v256_v0  ;;  %1482 = vmatprep.mubr.msk.f32.mxu1 %vm292_vm0, %v246_v2  ;;  %1472 = vmatprep.mubr.msk.f32.mxu0 %vm292_vm0, %v246_v2  ;;  %v254_v4 = vld [vmem:[#allocation7] sm:$0xff]  ;;  %v255_v5 = vld [vmem:[#allocation7 + $0x8] sm:$0xff]  ;;  %vm475_vm2 = vcmask 64512   ;;  %s242_s18 = scalar_lea.vmem [#allocation8], %s2127_s10 }
  0x7e   : > { %v1604_v6 = vpack.c.bf16 %v255_v5, %v254_v4  ;;  %v247_v7 = vld [vmem:[%s202_s11 + $0x8] sm:$0xff]  ;;  %v248_v8 = vld [vmem:[%s202_s11 + $0x10] sm:$0xff]  ;;  %v249_v9 = vld [vmem:[%s202_s11 + $0x18] sm:$0xff]  ;;  %s1256_s6 = sshll.u32 %s242_s18, 4  ;;  %s1399_s29 = sshll.u32 %s1959_s16, 9  ;;  %s2221_s6 = int_to_ptr.vmem [resolvable:$true] %s1256_s6 }
  0x7f   : > { %1609 = vmatprep.subr.bf16.mxu1 %v1608_v3  ;;  %v2162_v11 = vld [vmem:[%s2137_s9 + $0x8] sm:$0xff]  ;;  %v2165_v13 = vld [vmem:[%s2137_s9] sm:$0xff]  ;;  %v260_v19 = vld [vmem:[#allocation7 + $0x30] sm:$0xff]  ;;  %s2226_s23 = scalar_lea.hbm %s2273_s3, %s1399_s29  ;;  %s1243_s16 = scalar_lea.sflag [#allocation4], %s2124_s2 }
  0x80   : > { %1611 = vmatpush3.bf16.msra.mxu1 %v1608_v3  ;;  %1605 = vmatprep.subr.bf16.mxu0 %v1604_v6  ;;  %v258_v14 = vld [vmem:[#allocation7 + $0x20] sm:$0xff]  ;;  %v259_v15 = vld [vmem:[#allocation7 + $0x28] sm:$0xff]  ;;  %v261_v20 = vld [vmem:[#allocation7 + $0x38] sm:$0xff]  ;;  %s1832_s27 = scalar_lea.vmem %s2221_s6, 512  ;;  %s1915_s5 = smov [#allocation8]  }
  0x81   : > { %1607 = vmatpush3.bf16.msra.mxu0 %v1604_v6  ;;  %1493 = vmatprep.subr.mxu1 %v1913_v10  ;;  %v274_v17 = vld [vmem:[#allocation7 + $0xa0] sm:$0xff]  ;;  %v275_v18 = vld [vmem:[#allocation7 + $0xa8] sm:$0xff]  ;;  %v2175_v22 = vld [vmem:[%s2137_s9 + $0x18] sm:$0xff]  ;;  %v1612_v23 = vpack.c.bf16 %v259_v15, %v258_v14  ;;  %v1616_v31 = vpack.c.bf16 %v261_v20, %v260_v19  ;;  %p1833_p3 = scmp.ne.s32.totalorder %s2221_s6, %s1832_s27  ;;  %s1836_s8 = sshll.u32 %s1915_s5, 4  ;;  %s1837_s8 = int_to_ptr.vmem [resolvable:$false] %s1836_s8 }
  0x82   : > { %1488 = vmatprep.subr.mxu0 %v1913_v10  ;;  %v276_v24 = vld [vmem:[#allocation7 + $0xb0] sm:$0xff]  ;;  %v277_v25 = vld [vmem:[#allocation7 + $0xb8] sm:$0xff]  ;;  %v1644_v29 = vpack.c.bf16 %v275_v18, %v274_v17  ;;  %v262_v33 = vld [vmem:[#allocation7 + $0x40] sm:$0xff]  ;;  %s1838_s28 = scalar_lea.vmem %s1837_s8, 1024  ;;  %p1839_p1 = scmp.lt.s32.totalorder %s2221_s6, %s1837_s8 }
  0x83   : > { %1483 = vmatmul.mubr.msk.f32.vlgmr.msra.gmra.mrb[0].mxu1 %vm292_vm0, %v247_v7  ;;  %v2183_v28 = vld [vmem:[%s2137_s9 + $0x10] sm:$0xff]  ;;  %v1648_v32 = vpack.c.bf16 %v277_v25, %v276_v24  ;;  %v263_v34 = vld [vmem:[#allocation7 + $0x48] sm:$0xff]  ;;  %v278_v36 = vld [vmem:[#allocation7 + $0xc0] sm:$0xff]  ;;  %p1834_p7 = pnand %p1833_p3, %p2032_p12  ;;  %p1840_p5 = scmp.lt.s32.totalorder %s1838_s28, %s1832_s27 }
  0x84   : > { %1485 = vmatprep.mubr.msk.f32.mxu1 %vm292_vm0, %v248_v8  ;;  %1473 = vmatmul.mubr.msk.f32.vlgmr.msra.gmra.mrb[0].mxu0 %vm292_vm0, %v247_v7  ;;  %v279_v37 = vld [vmem:[#allocation7 + $0xc8] sm:$0xff]  ;;  %v1620_v39 = vpack.c.bf16 %v263_v34, %v262_v33  ;;  %v264_v41 = vld [vmem:[#allocation7 + $0x50] sm:$0xff]  ;;  %v265_v42 = vld [vmem:[#allocation7 + $0x58] sm:$0xff] }
  0x85   : > { %1475 = vmatprep.mubr.msk.f32.mxu0 %vm292_vm0, %v248_v8  ;;  %v1652_v40 = vpack.c.bf16 %v279_v37, %v278_v36  ;;  %v280_v43 = vld [vmem:[#allocation7 + $0xd0] sm:$0xff]  ;;  %v281_v44 = vld [vmem:[#allocation7 + $0xd8] sm:$0xff]  ;;  %v1624_v45 = vpack.c.bf16 %v265_v42, %v264_v41  ;;  %v266_v47 = vld [vmem:[#allocation7 + $0x60] sm:$0xff]  ;;  %p1835_p9 = pneg %p1834_p7  ;;  %p1841_p2 = por %p1840_p5, %p1839_p1 }
  0x86   : > { %v1656_v46 = vpack.c.bf16 %v281_v44, %v280_v43  ;;  %v267_v48 = vld [vmem:[#allocation7 + $0x68] sm:$0xff]  ;;  %v282_v49 = vld [vmem:[#allocation7 + $0xe0] sm:$0xff]  ;;  %v268_v53 = vld [vmem:[#allocation7 + $0x70] sm:$0xff] }
  0x87   : > { %1486 = vmatmul.mubr.msk.f32.gmra.mrb[2].mxu1 %vm292_vm0, %v249_v9  ;;  %v283_v50 = vld [vmem:[#allocation7 + $0xe8] sm:$0xff]  ;;  %v1628_v51 = vpack.c.bf16 %v267_v48, %v266_v47  ;;  %v269_v54 = vld [vmem:[#allocation7 + $0x78] sm:$0xff]  ;;  %v284_v55 = vld [vmem:[#allocation7 + $0xf0] sm:$0xff]  ;;  %p1842_p6 = pnand %p1841_p2, %p1835_p9 }
  0x88   : > { %1476 = vmatmul.mubr.msk.f32.gmra.mrb[2].mxu0 %vm292_vm0, %v249_v9  ;;  %1495 = vmatprep.mubr.msk.f32.mxu1 %vm1914_vm1, %v1913_v10  ;;  %v1660_v52 = vpack.c.bf16 %v283_v50, %v282_v49  ;;  %v285_v56 = vld [vmem:[#allocation7 + $0xf8] sm:$0xff]  ;;  %v1632_v57 = vpack.c.bf16 %v269_v54, %v268_v53  ;;  %v270_v59 = vld [vmem:[#allocation7 + $0x80] sm:$0xff]  ;;  %v271_v60 = vld [vmem:[#allocation7 + $0x88] sm:$0xff] }
  0x89   : > { %1490 = vmatprep.mubr.msk.f32.mxu0 %vm1914_vm1, %v1913_v10  ;;  %v1664_v58 = vpack.c.bf16 %v285_v56, %v284_v55  ;;  %v286_v61 = vld [vmem:[#allocation7 + $0x100] sm:$0xff]  ;;  %v1636_v62 = vpack.c.bf16 %v271_v60, %v270_v59  ;;  %v287_v63 = vld [vmem:[#allocation7 + $0x108] sm:$0xff]  ;;  %v272_v1 = vld [vmem:[#allocation7 + $0x90] sm:$0xff] }
  0x8a   : > { %v1668_v0 = vpack.c.bf16 %v287_v63, %v286_v61  ;;  %v273_v2 = vld [vmem:[#allocation7 + $0x98] sm:$0xff]  ;;  %v288_v3 = vld [vmem:[#allocation7 + $0x110] sm:$0xff]  ;;  %v290_v7 = vld [vmem:[#allocation7 + $0x120] sm:$0xff] }
  0x8b   : > { %v1640_v4 = vpack.c.bf16 %v273_v2, %v272_v1  ;;  %v289_v5 = vld [vmem:[#allocation7 + $0x118] sm:$0xff] }
  0x8c   : > { %v1672_v6 = vpack.c.bf16 %v289_v5, %v288_v3 }
 0x156   : > { %v1484_v12 = vpop.f32.mrb[0].mxu1 }
 0x157   : > { %v456_v16 = vpop.f32.mrb[1].mxu1  ;;  %1494 = vmatpush3.msra.mxu1 %v1484_v12  ;;  %v2169_v21 = vpop.f32.mrb[0].mxu0 }
 0x158   : > { %1489 = vmatpush3.msra.mxu0 %v456_v16  ;;  %1496 = vmatmul.mubr.msk.f32.vlgmr.msra.gmra.mrb[4].mxu1 %vm475_vm2, %v2162_v11  ;;  %v2177_v26 = vpop.f32.mrb[1].mxu0 }
 0x159   : > { %1491 = vmatmul.mubr.msk.f32.vlgmr.msra.gmra.mrb[4].mxu0 %vm475_vm2, %v2165_v13  ;;  %1503 = vmatprep.subr.mxu1 %v1913_v10 }
 0x15a   : > { %v1487_v27 = vpop.f32.mrb[2].mxu1  ;;  %1498 = vmatprep.subr.mxu0 %v1913_v10  ;;  %1505 = vmatprep.mubr.msk.f32.mxu1 %vm1914_vm1, %v1913_v10 }
 0x15b   : > { %v466_v30 = vpop.f32.mrb[3].mxu1  ;;  %1504 = vmatpush3.msra.mxu1 %v1487_v27  ;;  %1500 = vmatprep.mubr.msk.f32.mxu0 %vm1914_vm1, %v1913_v10  ;;  %v2189_v35 = vpop.f32.mrb[2].mxu0 }
 0x15c   : > { %1499 = vmatpush3.msra.mxu0 %v466_v30  ;;  %1506 = vmatmul.mubr.msk.f32.vlgmr.msra.gmra.mrb[6].mxu1 %vm475_vm2, %v2175_v22  ;;  %v2193_v38 = vpop.f32.mrb[3].mxu0 }
 0x15d   : > { %1501 = vmatmul.mubr.msk.f32.vlgmr.msra.gmra.mrb[6].mxu0 %vm475_vm2, %v2183_v28  ;;  %1613 = vmatprep.subr.bf16.mxu0 %v1612_v23 }
 0x15e   : > { %1645 = vmatprep.subr.bf16.mxu1 %v1644_v29  ;;  %1615 = vmatpush3.bf16.msra.mxu0 %v1612_v23 }
 0x15f   : > { %1647 = vmatpush3.bf16.msra.mxu1 %v1644_v29  ;;  %1617 = vmatprep.subr.bf16.mxu0 %v1616_v31 }
 0x160   : > { %1649 = vmatprep.subr.bf16.mxu1 %v1648_v32 }
 0x162   : > { %1619 = vmatpush3.bf16.msra.mxu0 %v1616_v31 }
 0x163   : > { %1651 = vmatpush3.bf16.msra.mxu1 %v1648_v32  ;;  %1621 = vmatprep.subr.bf16.mxu0 %v1620_v39 }
 0x164   : > { %1653 = vmatprep.subr.bf16.mxu1 %v1652_v40 }
 0x166   : > { %1623 = vmatpush3.bf16.msra.mxu0 %v1620_v39 }
 0x167   : > { %1655 = vmatpush3.bf16.msra.mxu1 %v1652_v40  ;;  %1625 = vmatprep.subr.bf16.mxu0 %v1624_v45 }
 0x168   : > { %1657 = vmatprep.subr.bf16.mxu1 %v1656_v46 }
 0x16a   : > { %1627 = vmatpush3.bf16.msra.mxu0 %v1624_v45 }
 0x16b   : > { %1659 = vmatpush3.bf16.msra.mxu1 %v1656_v46  ;;  %1629 = vmatprep.subr.bf16.mxu0 %v1628_v51 }
 0x16c   : > { %1661 = vmatprep.subr.bf16.mxu1 %v1660_v52 }
 0x16e   : > { %1631 = vmatpush3.bf16.msra.mxu0 %v1628_v51 }
 0x16f   : > { %1663 = vmatpush3.bf16.msra.mxu1 %v1660_v52  ;;  %1633 = vmatprep.subr.bf16.mxu0 %v1632_v57 }
 0x170   : > { %1665 = vmatprep.subr.bf16.mxu1 %v1664_v58 }
 0x172   : > { %1635 = vmatpush3.bf16.msra.mxu0 %v1632_v57 }
 0x173   : > { %1667 = vmatpush3.bf16.msra.mxu1 %v1664_v58  ;;  %1637 = vmatprep.subr.bf16.mxu0 %v1636_v62 }
 0x174   : > { %1669 = vmatprep.subr.bf16.mxu1 %v1668_v0 }
 0x176   : > { %1639 = vmatpush3.bf16.msra.mxu0 %v1636_v62 }
 0x177   : > { %1671 = vmatpush3.bf16.msra.mxu1 %v1668_v0  ;;  %1641 = vmatprep.subr.bf16.mxu0 %v1640_v4 }
 0x178   : > { %1673 = vmatprep.subr.bf16.mxu1 %v1672_v6 }
 0x17a   : > { %1643 = vmatpush3.bf16.msra.mxu0 %v1640_v4 }
 0x17b   : > { %1675 = vmatpush3.bf16.msra.mxu1 %v1672_v6  ;;  %1584 = vmatprep.subr.mxu0 %v1913_v10 }
 0x17c   : > { %1589 = vmatprep.subr.mxu1 %v1913_v10 }
 0x22b   : > { %v618_v8 = vpop.f32.mrb[4].mxu1 }
 0x22c   : > { %v769_v9 = vadd.f32 %v2169_v21, %v618_v8  ;;  %v545_v12 = vpop.f32.mrb[4].mxu0  ;;  %v1497_v14 = vpop.f32.mrb[5].mxu1 }
 0x22d   : > { %v768_v15 = vadd.f32 %v545_v12, %v2177_v26  ;;  %v1492_v16 = vpop.f32.mrb[5].mxu0 }
 0x22e   : > { %v773_v17 = vadd.f32 %v769_v9, %v290_v7 }
 0x22f   : > { %v772_v18 = vadd.f32 %v768_v15, %v290_v7  ;;  %v764_v19 = vpop.f32.mrb[6].mxu1 }
 0x230   : > { %v771_v20 = vadd.f32 %v2189_v35, %v764_v19  ;;  %v691_v23 = vpop.f32.mrb[6].mxu0  ;;  %v1507_v24 = vpop.f32.mrb[7].mxu1  ;;  %v777_v30 = vmax.f32 %v773_v17, 0.0 }
 0x231   : > { %v776_v25 = vmax.f32 %v772_v18, 0.0  ;;  %v770_v27 = vadd.f32 %v691_v23, %v2193_v38  ;;  %v1502_v29 = vpop.f32.mrb[7].mxu0 }
 0x232   : > { %v775_v31 = vadd.f32 %v771_v20, %v290_v7 }
 0x233   : > { %v774_v32 = vadd.f32 %v770_v27, %v290_v7  ;;  %1540 = vmatprep.mubr.f32.mxu0 %v776_v25  ;;  %1578 = vmatprep.mubr.f32.mxu1 %v776_v25 }
 0x234   : > { %1541 = vmatmul.mubr.f32.vlgmr.msra.gmra.mrb[8].mxu0 %v777_v30  ;;  %1579 = vmatmul.mubr.f32.vlgmr.msra.gmra.mrb[8].mxu1 %v777_v30  ;;  %v779_v26 = vmax.f32 %v775_v31, 0.0 }
 0x235   : > { %v778_v21 = vmax.f32 %v774_v32, 0.0 }
 0x237   : > { %1543 = vmatprep.mubr.f32.mxu0 %v778_v21  ;;  %1581 = vmatprep.mubr.f32.mxu1 %v778_v21 }
 0x238   : > { %1544 = vmatmul.mubr.f32.gmra.mrb[10].mxu0 %v779_v26  ;;  %1582 = vmatmul.mubr.f32.gmra.mrb[10].mxu1 %v779_v26 }
 0x239   : > { %1591 = vmatprep.mubr.msk.f32.mxu1 %vm1914_vm1, %v1913_v10  ;;  %1586 = vmatprep.mubr.msk.f32.mxu0 %vm1914_vm1, %v1913_v10 }
 0x307   : > { %v1542_v33 = vpop.f32.mrb[8].mxu0  ;;  %v1580_v34 = vpop.f32.mrb[8].mxu1 }
 0x308   : > { %v846_v35 = vpop.f32.mrb[9].mxu0  ;;  %v931_v36 = vpop.f32.mrb[9].mxu1  ;;  %1590 = vmatpush3.msra.mxu1 %v1580_v34 }
 0x309   : > { %1585 = vmatpush3.msra.mxu0 %v931_v36  ;;  %1592 = vmatmul.mubr.msk.f32.vlgmr.msra.gmra.mrb[12].mxu1 %vm475_vm2, %v2162_v11  ;;  %v291_v11 = vld [vmem:[#allocation7 + $0x128] sm:$0xff] }
 0x30a   : > { %1587 = vmatmul.mubr.msk.f32.vlgmr.msra.gmra.mrb[12].mxu0 %vm475_vm2, %v2165_v13  ;;  %1599 = vmatprep.subr.mxu1 %v1913_v10 }
 0x30b   : > { %v1545_v37 = vpop.f32.mrb[10].mxu0  ;;  %v1583_v38 = vpop.f32.mrb[10].mxu1  ;;  %1594 = vmatprep.subr.mxu0 %v1913_v10  ;;  %1601 = vmatprep.mubr.msk.f32.mxu1 %vm1914_vm1, %v1913_v10 }
 0x30c   : > { %v856_v39 = vpop.f32.mrb[11].mxu0  ;;  %v941_v40 = vpop.f32.mrb[11].mxu1  ;;  %1600 = vmatpush3.msra.mxu1 %v1583_v38  ;;  %1596 = vmatprep.mubr.msk.f32.mxu0 %vm1914_vm1, %v1913_v10 }
 0x30d   : > { %1595 = vmatpush3.msra.mxu0 %v941_v40  ;;  %1602 = vmatmul.mubr.msk.f32.vlgmr.msra.gmra.mrb[14].mxu1 %vm475_vm2, %v2175_v22 }
 0x30e   : > { %1597 = vmatmul.mubr.msk.f32.vlgmr.msra.gmra.mrb[14].mxu0 %vm475_vm2, %v2183_v28 }
 0x3dc   : > { %v1086_v13 = vpop.f32.mrb[12].mxu1 }
 0x3dd   : > { %v1231_v41 = vadd.f32 %v1542_v33, %v1086_v13  ;;  %v1016_v42 = vpop.f32.mrb[12].mxu0  ;;  %v1593_v43 = vpop.f32.mrb[13].mxu1 }
 0x3de   : > { %v1230_v44 = vadd.f32 %v1016_v42, %v846_v35  ;;  %v1588_v45 = vpop.f32.mrb[13].mxu0 }
 0x3df   : > { %v1235_v46 = vadd.f32 %v1231_v41, %v291_v11 }
 0x3e0   : > { %v1234_v47 = vadd.f32 %v1230_v44, %v291_v11  ;;  %v1226_v10 = vpop.f32.mrb[14].mxu1 }
 0x3e1   : > { %1239 = vst [vmem:[%s242_s18 + $0x8] sm:$0xff] %v1235_v46  ;;  %v1233_v22 = vadd.f32 %v1545_v37, %v1226_v10  ;;  %v1156_v48 = vpop.f32.mrb[14].mxu0  ;;  %v1603_v49 = vpop.f32.mrb[15].mxu1 }
 0x3e2   : > { %1238 = vst [vmem:[%s242_s18] sm:$0xff] %v1234_v47  ;;  %v1232_v28 = vadd.f32 %v1156_v48, %v856_v39  ;;  %v1598_v50 = vpop.f32.mrb[15].mxu0 }
 0x3e3   : > { %v1237_v51 = vadd.f32 %v1233_v22, %v291_v11 }
 0x3e4   : > { %v1236_v52 = vadd.f32 %v1232_v28, %v291_v11 }
 0x3e5   : > { %1241 = vst [vmem:[%s242_s18 + $0x18] sm:$0xff] %v1237_v51 }
 0x3e6   : > { %1240 = vst [vmem:[%s242_s18 + $0x10] sm:$0xff] %v1236_v52 }
 0x3e7   : > { %1845 = shalt.err (!%p1842_p6)
}
 0x3e8   : > { %s1846_s22 = scalar_lea.hbm %s2226_s23, 512  ;;  %s1850_s10 = scalar_lea.hbm %s2273_s3, 1024 }
 0x3e9   : > { %p1847_p8 = scmp.ne.s32.totalorder %s2226_s23, %s1846_s22  ;;  %p1851_p4 = scmp.lt.u32.totalorder %s2226_s23, %s2273_s3 }
 0x3ea   : > { %p1852_p11 = scmp.lt.u32.totalorder %s1850_s10, %s1846_s22  ;;  %p1854_p3 = scmp.lt.u32.totalorder %s1846_s22, %s2226_s23 }
 0x3eb   : > { %p1848_p10 = pnand %p1847_p8, %p2032_p12 }
 0x3ec   : > { %p1853_p13 = por %p1852_p11, %p1851_p4 }
 0x3ed   : > { %p1849_p0 = pneg %p1848_p10 }
 0x3ee   : > { %p1855_p7 = por %p1854_p3, %p1853_p13 }
 0x3f0   : > { %p1856_p9 = pnand %p1855_p7, %p1849_p0 }
 0x3f2   : > { %1859 = shalt.err (!%p1856_p9)
}
 0x3f3   : > { %s1916_s20 = smov 128   ;;  %s1917_s7 = smov 8  }
 0x3f4   : > { %1684 = dma.vmem_to_hbm [thread:$0]  (%p2032_p12), %s2221_s6, 512, %s2226_s23, %s1243_s16, %s1916_s20, %s1916_s20, %s1917_s7  }
 0x3f5 PF: > { %s1271_s9 = sand.u32 1, %s1894_s12   ;;  %p2298_p1 = scmp.ne.s32.totalorder %s2284_s19, 0 }
 0x3f6   : > { %p2299_p5 = scmp.ge.s32.totalorder %s1906_s15, 2  ;;  %s1272_s18 = scalar_lea.sflag [#allocation4], %s1271_s9 }
 0x3f8   : > { %p1698_p2 = pnand %p2299_p5, %p2298_p1 }
 0x3fa   : > { %1889 = dma.done.wait (!%p1698_p2), %s1272_s18, 512  }
 0x3fb   : > { %1891 = vsyncadd (!%p1698_p2), %s1272_s18, 4294966784  ;;  %p19_p6 = scmp.ge.s32.totalorder %s1994_s24, 4   ;;  %s2300_s12 = smov %s1898_s13 }
 0x3fc   : > { %s2301_s13 = smov %s1902_s14  ;;  %s2302_s14 = smov %s2028_s17 }
 0x3fd   : > { %s2303_s15 = smov %s1994_s24  ;;  %21 = sbr.rel (!%p19_p6) target bundleno = 10 (0xa), region = 94 }
 0x404   :  { %1277 = vsyncpa [#allocation3], 1 }
 0x405   :  { %1279 = vsyncpa [#allocation3 + $0x1], 1 }
 0x406   :  { %1280 = vsyncpa [#allocation6], 1 }
 0x407   :  { %1282 = vsyncpa [#allocation6 + $0x1], 1 }
 0x408   :  { %1283 = vsyncpa [#allocation4], 1 }
 0x409   :  { %1285 = vsyncpa [#allocation4 + $0x1], 1 }

</bundles_post_ra>
